<compile_context>
chip_gen: v7x
topology: tpu7x:2x2x1
jax: 0.10.0
libtpu: 0.0.40
codegen_flags: <defaults>
</compile_context>

<pallas_src>
import functools

import jax
import jax.numpy as jnp
from jax import lax
from jax.experimental import pallas as pl
from jax.experimental.pallas import tpu as pltpu


def _warp_kernel(flow_ref, img_ref, out_ref, *, C, K, R, W, sx, sy, contract_x):
    # flow_ref: (2, T)    f32  -- [flow_x ; flow_y] for this batch / pixel tile
    # img_ref : (C*R, K)  f32  -- full input image of this batch (K = MXU axis)
    # out_ref : (C, T)
    T = out_ref.shape[-1]
    w_f = float(W)

    # ---- output pixel (x, y) from the flat pixel index (no HBM base stream).
    # Float divide + floor can be off by at most one; the +/-1 correction below
    # makes the decompose exact for N < 2^23 (asserted in the wrapper).
    lane = lax.broadcasted_iota(jnp.int32, (1, T), 1)
    q = (lane + pl.program_id(1) * T).astype(jnp.float32)
    y = jnp.floor(q * (1.0 / w_f))
    x = q - y * w_f
    over = x < 0.0
    y = jnp.where(over, y - 1.0, y)
    x = jnp.where(over, x + w_f, x)
    under = x >= w_f
    y = jnp.where(under, y + 1.0, y)
    x = jnp.where(under, x - w_f, x)

    # ---- sample coordinates in input-image pixel space
    # (grid_sample, align_corners=False):  i = (p + flow) * size/(grid-1) - 0.5
    ix = (x + flow_ref[0:1, :]) * sx - 0.5            # along Win
    iy = (y + flow_ref[1:2, :]) * sy - 0.5            # along Hin
    ck, cr = (ix, iy) if contract_x else (iy, ix)

    # ---- separable bilinear "tent" weights (zeros-padding semantics: rows
    # outside [0, size-1] simply do not exist).
    def tent(coord, size):
        rows = lax.broadcasted_iota(jnp.int32, (size, T), 0).astype(jnp.float32)
        return jnp.maximum(1.0 - jnp.abs(rows - coord), 0.0)

    wk = tent(ck, K)                                  # (K, T)
    wr = tent(cr, R)                                  # (R, T)

    # ---- K-axis contraction on the MXU: (C*R, K) @ (K, T) -> (C*R, T)
    u = jnp.dot(img_ref[...], wk, preferred_element_type=jnp.float32)

    # ---- R-axis contraction: per-channel multiply + sublane reduce written
    # directly into the output rows (no concatenate).
    # TODO(synk): for very large C, replace this trace-time unrolled loop with
    # a constant per-channel segment-sum matmul on the MXU.
    for c in range(C):
        out_ref[c:c + 1, :] = jnp.sum(
            u[c * R:(c + 1) * R, :] * wr, axis=0, keepdims=True
        ).astype(out_ref.dtype)


def _physical_vmem_bytes():
    try:
        return int(pltpu.get_tpu_info().vmem_capacity_bytes)
    except Exception:
        return 64 << 20  # v7x-safe fallback


def warper2d(flow, img, img_size):
    """Pallas implementation of Warper2d.forward(flow, img)."""
    H, W = img_size
    B, C, Hin, Win = img.shape

    # torch: F.pad(flow, [pad]*4, 'replicate') when flow is smaller than img
    if flow.shape[2:] != img.shape[2:]:
        pad = int((img.shape[2] - flow.shape[2]) // 2)
        flow = jnp.pad(flow, ((0, 0), (0, 0), (pad, pad), (pad, pad)), mode="edge")
    assert flow.shape[2:] == (H, W), "grid (img_size) and padded flow must match"

    N = H * W
    assert N < (1 << 23), "in-kernel pixel-index decompose assumes < 2^23 output pixels"
    # i = (p + flow) * size/(grid-1) - 0.5  (normalize + unnormalize folded);
    # max() guards the degenerate 1-pixel-grid divide-by-zero.
    sx = float(Win) / float(max(W - 1, 1))
    sy = float(Hin) / float(max(H - 1, 1))

    # Contract over the *larger* spatial axis on the MXU (better K-fill,
    # especially for the fp32 multi-pass MXU path on v5e).
    contract_x = Win >= Hin
    if contract_x:
        K, R = Win, Hin
        img_mat = img.reshape(B, C * Hin, Win)
    else:
        K, R = Hin, Win
        img_mat = jnp.swapaxes(img, 2, 3).reshape(B, C * Win, Hin)
    img_mat = img_mat.astype(jnp.float32)
    flow_flat = flow.reshape(B, 2, N).astype(jnp.float32)

    phys_vmem = _physical_vmem_bytes()

    # --- lane-dense tiling of the output-pixel axis, sized from VMEM budget.
    def _rsub(n):
        return ((n + 7) // 8) * 8

    def _rlane(n):
        return ((n + 127) // 128) * 128

    per_col = 4 * (_rsub(K) + _rsub(R) + _rsub(C * R) + _rsub(C) + 24)  # temporaries
    per_col += 4 * 2 * (2 + C)                                          # streamed blocks (x2 buffers)
    budget = max(4 << 20, phys_vmem // 5)
    cap = max(128, min(8192, (budget // per_col) // 128 * 128))
    n128 = ((N + 127) // 128) * 128
    if n128 <= cap:
        tile, n_pad = n128, n128
    else:
        tile = cap
        n_pad = ((N + tile - 1) // tile) * tile
    if n_pad != N:
        flow_flat = jnp.pad(flow_flat, ((0, 0), (0, 0), (0, n_pad - N)))

    vmem_est = (4 * tile * (_rsub(K) + _rsub(R) + _rsub(C * R) + _rsub(C) + 24)
                + 8 * (2 * tile + C * tile + C * R * _rlane(K))
                + (4 << 20))
    vmem_limit = int(min(max(32 << 20, vmem_est), max(32 << 20, phys_vmem * 3 // 4)))

    grid = (B, n_pad // tile)
    kernel = functools.partial(_warp_kernel, C=C, K=K, R=R, W=W,
                               sx=sx, sy=sy, contract_x=contract_x)

    out_flat = pl.pallas_call(
        kernel,
        out_shape=jax.ShapeDtypeStruct((B, C, n_pad), jnp.float32),
        grid_spec=pltpu.PrefetchScalarGridSpec(
            num_scalar_prefetch=0,
            grid=grid,
            in_specs=[
                # flow tile for (batch b, pixel-tile nt)
                pl.BlockSpec((None, 2, tile), lambda b, nt: (b, 0, nt)),
                # full image of batch b; index only depends on the outer axis,
                # so the block stays resident in VMEM across the inner tiles.
                pl.BlockSpec((None, C * R, K), lambda b, nt: (b, 0, 0)),
            ],
            out_specs=pl.BlockSpec((None, C, tile), lambda b, nt: (b, 0, nt)),
        ),
        compiler_params=pltpu.CompilerParams(
            dimension_semantics=("parallel", "parallel"),
            vmem_limit_bytes=vmem_limit,
        ),
    )(flow_flat, img_mat)

    return out_flat[:, :, :N].reshape(B, C, H, W)


def warper2d_ref(flow, img, img_size):
    """Pure-JAX reference mirroring torch Warper2d + F.grid_sample semantics."""
    H, W = img_size
    B, C, Hin, Win = img.shape
    if flow.shape[2:] != img.shape[2:]:
        pad = int((img.shape[2] - flow.shape[2]) // 2)
        flow = jnp.pad(flow, ((0, 0), (0, 0), (pad, pad), (pad, pad)), mode="edge")

    xx = jnp.broadcast_to(jnp.arange(W, dtype=jnp.float32)[None, :], (H, W))
    yy = jnp.broadcast_to(jnp.arange(H, dtype=jnp.float32)[:, None], (H, W))
    vx = xx[None] + flow[:, 0]
    vy = yy[None] + flow[:, 1]
    xn = 2.0 * vx / (W - 1) - 1.0
    yn = 2.0 * vy / (H - 1) - 1.0
    ix = ((xn + 1.0) * Win - 1.0) * 0.5
    iy = ((yn + 1.0) * Hin - 1.0) * 0.5

    x0 = jnp.floor(ix)
    y0 = jnp.floor(iy)
    x1 = x0 + 1.0
    y1 = y0 + 1.0
    wx1 = ix - x0
    wx0 = 1.0 - wx1
    wy1 = iy - y0
    wy0 = 1.0 - wy1

    img_flat = img.reshape(B, C, Hin * Win)

    def corner(xf, yf, w):
        valid = ((xf >= 0) & (xf <= Win - 1) & (yf >= 0) & (yf <= Hin - 1)).astype(jnp.float32)
        xi = jnp.clip(xf, 0, Win - 1).astype(jnp.int32)
        yi = jnp.clip(yf, 0, Hin - 1).astype(jnp.int32)
        idx = (yi * Win + xi).reshape(B, 1, H * W)
        vals = jnp.take_along_axis(img_flat, jnp.broadcast_to(idx, (B, C, H * W)), axis=2)
        return vals.reshape(B, C, H, W) * (w * valid)[:, None]

    return (corner(x0, y0, wx0 * wy0) + corner(x1, y0, wx1 * wy0)
            + corner(x0, y1, wx0 * wy1) + corner(x1, y1, wx1 * wy1))


if __name__ == "__main__":
    img_size = (16, 16)
    B, C = 2, 4

    key = jax.random.PRNGKey(0)
    kf, ki, kf2, ki3, kf3 = jax.random.split(key, 5)
    flow = jax.random.normal(kf, (B, 2, *img_size), dtype=jnp.float32) * 3.0
    img = jax.random.normal(ki, (B, C, *img_size), dtype=jnp.float32)

    out = jax.block_until_ready(warper2d(flow, img, img_size))
    ref = warper2d_ref(flow, img, img_size)
    assert out.shape == (B, C, *img_size)
    assert jnp.allclose(out, ref, rtol=1e-4, atol=1e-4), "mismatch vs reference"

    # Smaller flow -> replicate-padded path of the original module.
    flow_small = jax.random.normal(kf2, (B, 2, 12, 12), dtype=jnp.float32) * 3.0
    out2 = jax.block_until_ready(warper2d(flow_small, img, img_size))
    ref2 = warper2d_ref(flow_small, img, img_size)
    assert jnp.allclose(out2, ref2, rtol=1e-4, atol=1e-4), "mismatch vs reference (padded flow)"

    # Non-square image (Hin > Win): exercises the swapped (contract-over-y) MXU
    # layout and the lane-padding path (N = 240 -> 256).
    img_size3 = (20, 12)
    img3 = jax.random.normal(ki3, (B, C, *img_size3), dtype=jnp.float32)
    flow3 = jax.random.normal(kf3, (B, 2, *img_size3), dtype=jnp.float32) * 3.0
    out3 = jax.block_until_ready(warper2d(flow3, img3, img_size3))
    ref3 = warper2d_ref(flow3, img3, img_size3)
    assert out3.shape == (B, C, *img_size3)
    assert jnp.allclose(out3, ref3, rtol=1e-4, atol=1e-4), "mismatch vs reference (non-square)"

    print("KERNEL_OK")
</pallas_src>

<mosaic_0001>
module attributes {stable_mosaic.version = 11 : i64} {
  func.func @_warp_kernel(%arg0: i32, %arg1: i32, %arg2: memref<1x2x256xf32, #tpu.memory_space<vmem>>, %arg3: memref<1x64x16xf32, #tpu.memory_space<vmem>>, %arg4: memref<1x4x256xf32, #tpu.memory_space<vmem>>) attributes {dimension_semantics = [#tpu.dimension_semantics<parallel>, #tpu.dimension_semantics<parallel>], iteration_bounds = array<i64: 2, 1>, scalar_prefetch = 0 : i64, scratch_operands = 0 : i64, tpu.core_type = #tpu.core_type<tc>, window_params = [{transform_indices = @transform_0, window_bounds = array<i64: 1, 2, 256>}, {transform_indices = @transform_1, window_bounds = array<i64: 1, 64, 16>}, {transform_indices = @transform_2, window_bounds = array<i64: 1, 4, 256>}]} {
    %0 = tpu.iota {dimensions = array<i32: 1>} : vector<1x256xi32>
    %c256_i32 = arith.constant 256 : i32
    %1 = arith.muli %arg1, %c256_i32 : i32
    %2 = vector.broadcast %1 : i32 to vector<1x256xi32>
    %3 = arith.addi %0, %2 : vector<1x256xi32>
    %4 = arith.sitofp %3 : vector<1x256xi32> to vector<1x256xf32>
    %cst = arith.constant 6.250000e-02 : f32
    %5 = vector.broadcast %cst : f32 to vector<1x256xf32>
    %6 = arith.mulf %4, %5 : vector<1x256xf32>
    %7 = math.floor %6 : vector<1x256xf32>
    %cst_0 = arith.constant 1.600000e+01 : f32
    %8 = vector.broadcast %cst_0 : f32 to vector<1x256xf32>
    %9 = arith.mulf %7, %8 : vector<1x256xf32>
    %10 = arith.subf %4, %9 : vector<1x256xf32>
    %cst_1 = arith.constant 0.000000e+00 : f32
    %11 = vector.broadcast %cst_1 : f32 to vector<1x256xf32>
    %12 = arith.cmpf olt, %10, %11 : vector<1x256xf32>
    %cst_2 = arith.constant 1.000000e+00 : f32
    %13 = vector.broadcast %cst_2 : f32 to vector<1x256xf32>
    %14 = arith.subf %7, %13 : vector<1x256xf32>
    %15 = arith.select %12, %14, %7 : vector<1x256xi1>, vector<1x256xf32>
    %cst_3 = arith.constant 1.600000e+01 : f32
    %16 = vector.broadcast %cst_3 : f32 to vector<1x256xf32>
    %17 = arith.addf %10, %16 : vector<1x256xf32>
    %18 = arith.select %12, %17, %10 : vector<1x256xi1>, vector<1x256xf32>
    %cst_4 = arith.constant 1.600000e+01 : f32
    %19 = vector.broadcast %cst_4 : f32 to vector<1x256xf32>
    %20 = arith.cmpf oge, %18, %19 : vector<1x256xf32>
    %cst_5 = arith.constant 1.000000e+00 : f32
    %21 = vector.broadcast %cst_5 : f32 to vector<1x256xf32>
    %22 = arith.addf %15, %21 : vector<1x256xf32>
    %23 = arith.select %20, %22, %15 : vector<1x256xi1>, vector<1x256xf32>
    %cst_6 = arith.constant 1.600000e+01 : f32
    %24 = vector.broadcast %cst_6 : f32 to vector<1x256xf32>
    %25 = arith.subf %18, %24 : vector<1x256xf32>
    %26 = arith.select %20, %25, %18 : vector<1x256xi1>, vector<1x256xf32>
    %c0 = arith.constant 0 : index
    %c0_7 = arith.constant 0 : index
    %c0_8 = arith.constant 0 : index
    %27 = vector.load %arg2[%c0, %c0_7, %c0_8] : memref<1x2x256xf32, #tpu.memory_space<vmem>>, vector<1x1x256xf32>
    %28 = vector.shape_cast %27 : vector<1x1x256xf32> to vector<1x256xf32>
    %29 = arith.addf %26, %28 : vector<1x256xf32>
    %cst_9 = arith.constant 1.06666672 : f32
    %30 = vector.broadcast %cst_9 : f32 to vector<1x256xf32>
    %31 = arith.mulf %29, %30 : vector<1x256xf32>
    %cst_10 = arith.constant 5.000000e-01 : f32
    %32 = vector.broadcast %cst_10 : f32 to vector<1x256xf32>
    %33 = arith.subf %31, %32 : vector<1x256xf32>
    %c0_11 = arith.constant 0 : index
    %c1 = arith.constant 1 : index
    %c0_12 = arith.constant 0 : index
    %34 = vector.load %arg2[%c0_11, %c1, %c0_12] : memref<1x2x256xf32, #tpu.memory_space<vmem>>, vector<1x1x256xf32>
    %35 = vector.shape_cast %34 : vector<1x1x256xf32> to vector<1x256xf32>
    %36 = arith.addf %23, %35 : vector<1x256xf32>
    %cst_13 = arith.constant 1.06666672 : f32
    %37 = vector.broadcast %cst_13 : f32 to vector<1x256xf32>
    %38 = arith.mulf %36, %37 : vector<1x256xf32>
    %cst_14 = arith.constant 5.000000e-01 : f32
    %39 = vector.broadcast %cst_14 : f32 to vector<1x256xf32>
    %40 = arith.subf %38, %39 : vector<1x256xf32>
    %41 = tpu.iota {dimensions = array<i32: 0>} : vector<16x256xi32>
    %42 = arith.sitofp %41 : vector<16x256xi32> to vector<16x256xf32>
    %43 = vector.broadcast %33 : vector<1x256xf32> to vector<16x256xf32>
    %44 = arith.subf %42, %43 : vector<16x256xf32>
    %45 = math.absf %44 : vector<16x256xf32>
    %cst_15 = arith.constant 1.000000e+00 : f32
    %46 = vector.broadcast %cst_15 : f32 to vector<16x256xf32>
    %47 = arith.subf %46, %45 : vector<16x256xf32>
    %cst_16 = arith.constant 0.000000e+00 : f32
    %48 = vector.broadcast %cst_16 : f32 to vector<16x256xf32>
    %49 = arith.maximumf %47, %48 : vector<16x256xf32>
    %50 = tpu.iota {dimensions = array<i32: 0>} : vector<16x256xi32>
    %51 = arith.sitofp %50 : vector<16x256xi32> to vector<16x256xf32>
    %52 = vector.broadcast %40 : vector<1x256xf32> to vector<16x256xf32>
    %53 = arith.subf %51, %52 : vector<16x256xf32>
    %54 = math.absf %53 : vector<16x256xf32>
    %cst_17 = arith.constant 1.000000e+00 : f32
    %55 = vector.broadcast %cst_17 : f32 to vector<16x256xf32>
    %56 = arith.subf %55, %54 : vector<16x256xf32>
    %cst_18 = arith.constant 0.000000e+00 : f32
    %57 = vector.broadcast %cst_18 : f32 to vector<16x256xf32>
    %58 = arith.maximumf %56, %57 : vector<16x256xf32>
    %c0_19 = arith.constant 0 : index
    %c0_20 = arith.constant 0 : index
    %c0_21 = arith.constant 0 : index
    %59 = vector.load %arg3[%c0_19, %c0_20, %c0_21] : memref<1x64x16xf32, #tpu.memory_space<vmem>>, vector<1x64x16xf32>
    %60 = vector.shape_cast %59 : vector<1x64x16xf32> to vector<64x16xf32>
    %cst_22 = arith.constant dense<0.000000e+00> : vector<64x256xf32>
    %61 = tpu.matmul %60, %49, %cst_22 {dimension_numbers = #tpu.dot_dimension_numbers<[1], [0], [0], [1], [0, 0, 1, 1], [], []>} : vector<64x16xf32>, vector<16x256xf32>, vector<64x256xf32> -> vector<64x256xf32>
    %62 = vector.extract_strided_slice %61 {offsets = [0, 0], sizes = [16, 256], strides = [1, 1]} : vector<64x256xf32> to vector<16x256xf32>
    %63 = arith.mulf %62, %58 : vector<16x256xf32>
    %cst_23 = arith.constant dense<0.000000e+00> : vector<256xf32>
    %64 = vector.multi_reduction <add>, %63, %cst_23 [0] : vector<16x256xf32> to vector<256xf32>
    %65 = vector.shape_cast %64 : vector<256xf32> to vector<1x256xf32>
    %c0_24 = arith.constant 0 : index
    %c0_25 = arith.constant 0 : index
    %c0_26 = arith.constant 0 : index
    %66 = vector.load %arg4[%c0_24, %c0_25, %c0_26] : memref<1x4x256xf32, #tpu.memory_space<vmem>>, vector<1x1x256xf32>
    %67 = vector.shape_cast %66 : vector<1x1x256xf32> to vector<1x256xf32>
    %68 = vector.shape_cast %65 : vector<1x256xf32> to vector<1x1x256xf32>
    tpu.vector_store %arg4[%c0_24, %c0_25, %c0_26], %68 {strides = array<i32>} : memref<1x4x256xf32, #tpu.memory_space<vmem>>, vector<1x1x256xf32>,
    %69 = vector.extract_strided_slice %61 {offsets = [16, 0], sizes = [16, 256], strides = [1, 1]} : vector<64x256xf32> to vector<16x256xf32>
    %70 = arith.mulf %69, %58 : vector<16x256xf32>
    %cst_27 = arith.constant dense<0.000000e+00> : vector<256xf32>
    %71 = vector.multi_reduction <add>, %70, %cst_27 [0] : vector<16x256xf32> to vector<256xf32>
    %72 = vector.shape_cast %71 : vector<256xf32> to vector<1x256xf32>
    %c0_28 = arith.constant 0 : index
    %c1_29 = arith.constant 1 : index
    %c0_30 = arith.constant 0 : index
    %73 = vector.load %arg4[%c0_28, %c1_29, %c0_30] : memref<1x4x256xf32, #tpu.memory_space<vmem>>, vector<1x1x256xf32>
    %74 = vector.shape_cast %73 : vector<1x1x256xf32> to vector<1x256xf32>
    %75 = vector.shape_cast %72 : vector<1x256xf32> to vector<1x1x256xf32>
    tpu.vector_store %arg4[%c0_28, %c1_29, %c0_30], %75 {strides = array<i32>} : memref<1x4x256xf32, #tpu.memory_space<vmem>>, vector<1x1x256xf32>,
    %76 = vector.extract_strided_slice %61 {offsets = [32, 0], sizes = [16, 256], strides = [1, 1]} : vector<64x256xf32> to vector<16x256xf32>
    %77 = arith.mulf %76, %58 : vector<16x256xf32>
    %cst_31 = arith.constant dense<0.000000e+00> : vector<256xf32>
    %78 = vector.multi_reduction <add>, %77, %cst_31 [0] : vector<16x256xf32> to vector<256xf32>
    %79 = vector.shape_cast %78 : vector<256xf32> to vector<1x256xf32>
    %c0_32 = arith.constant 0 : index
    %c2 = arith.constant 2 : index
    %c0_33 = arith.constant 0 : index
    %80 = vector.load %arg4[%c0_32, %c2, %c0_33] : memref<1x4x256xf32, #tpu.memory_space<vmem>>, vector<1x1x256xf32>
    %81 = vector.shape_cast %80 : vector<1x1x256xf32> to vector<1x256xf32>
    %82 = vector.shape_cast %79 : vector<1x256xf32> to vector<1x1x256xf32>
    tpu.vector_store %arg4[%c0_32, %c2, %c0_33], %82 {strides = array<i32>} : memref<1x4x256xf32, #tpu.memory_space<vmem>>, vector<1x1x256xf32>,
    %83 = vector.extract_strided_slice %61 {offsets = [48, 0], sizes = [16, 256], strides = [1, 1]} : vector<64x256xf32> to vector<16x256xf32>
    %84 = arith.mulf %83, %58 : vector<16x256xf32>
    %cst_34 = arith.constant dense<0.000000e+00> : vector<256xf32>
    %85 = vector.multi_reduction <add>, %84, %cst_34 [0] : vector<16x256xf32> to vector<256xf32>
    %86 = vector.shape_cast %85 : vector<256xf32> to vector<1x256xf32>
    %c0_35 = arith.constant 0 : index
    %c3 = arith.constant 3 : index
    %c0_36 = arith.constant 0 : index
    %87 = vector.load %arg4[%c0_35, %c3, %c0_36] : memref<1x4x256xf32, #tpu.memory_space<vmem>>, vector<1x1x256xf32>
    %88 = vector.shape_cast %87 : vector<1x1x256xf32> to vector<1x256xf32>
    %89 = vector.shape_cast %86 : vector<1x256xf32> to vector<1x1x256xf32>
    tpu.vector_store %arg4[%c0_35, %c3, %c0_36], %89 {strides = array<i32>} : memref<1x4x256xf32, #tpu.memory_space<vmem>>, vector<1x1x256xf32>,
    return
  }
  func.func @transform_0(%arg0: i32, %arg1: i32) -> (i32, i32, i32) {
    %c0_i32 = arith.constant 0 : i32
    %c0_i32_0 = arith.constant 0 : i32
    return %arg0, %c0_i32, %arg1 : i32, i32, i32
  }
  func.func @transform_1(%arg0: i32, %arg1: i32) -> (i32, i32, i32) {
    %c0_i32 = arith.constant 0 : i32
    %c0_i32_0 = arith.constant 0 : i32
    %c0_i32_1 = arith.constant 0 : i32
    return %arg0, %c0_i32, %c0_i32_0 : i32, i32, i32
  }
  func.func @transform_2(%arg0: i32, %arg1: i32) -> (i32, i32, i32) {
    %c0_i32 = arith.constant 0 : i32
    %c0_i32_0 = arith.constant 0 : i32
    return %arg0, %c0_i32, %arg1 : i32, i32, i32
  }
}

</mosaic_0001>

<bundles_post_ra>
// kernel: tpu_custom_call.1
= control target key start
LH: loop header
LB: loop body
LE: loop exit
PB: predicated region body
PF: predicated region fallthrough
CT: control target
= control target key end

     0   :  { %7 = vsyncpa [#allocation3], 0  ;;  %s1119_s0 = inlined_call_operand.vmem [shape: f32[2,2,256], index: 0, kind: input, shape index: {}]   ;;  %s1120_s1 = inlined_call_operand.vmem [shape: f32[2,64,16], index: 1, kind: input, shape index: {}]   ;;  %s1121_s2 = inlined_call_operand.hbm [shape: f32[2,4,256], index: 2, kind: output, shape index: {}]  }
   0x1   :  { %9 = vsyncpa [#allocation3 + $0x1], 0  ;;  %s925_s9 = smov 0   ;;  %s927_s10 = smov 0  }
   0x2   :  { %s929_s11 = smov 0   ;;  %s931_s12 = smov 0  }
   0x3   :  { %s933_s13 = smov 0   ;;  %s935_s14 = smov 0  }
   0x4 LB: > { %s726_s15 = sadd.s32 4294967295, %s905_s14   ;;  %s727_s16 = sadd.s32 4294967294, %s905_s14   ;;  %s905_s14 = sphi %s935_s14, %s15_s14   ;;  %s901_s13 = sphi %s933_s13, %s1130_s13   ;;  %s897_s12 = sphi %s931_s12, %s1129_s12   ;;  %s893_s11 = sphi %s929_s11, %s1128_s11   ;;  %s889_s10 = sphi %s927_s10, %s1127_s10   ;;  %s885_s9 = sphi %s925_s9, %s1126_s9  }
   0x5   : > { %s27_s17 = sadd.s32 1, %s901_s13  ;;  %s90_s18 = sadd.s32 1, %s893_s11 }
   0x6   : > { %p29_p0 = scmp.ge.s32.totalorder %s27_s17, 2  ;;  %p100_p1 = scmp.ne.s32.totalorder %s893_s11, %s889_s10 }
   0x7   : > { %p101_p2 = scmp.eq.s32.totalorder %s726_s15, 1  ;;  %p106_p3 = scmp.ne.s32.totalorder %s889_s10, %s885_s9 }
   0x8   : > { %s1132_s17 = smov (%p29_p0, %s27_s17), 0  ;;  %p107_p5 = scmp.eq.s32.totalorder %s727_s16, 1 }
   0x9   : > { %p965_p4 = por %p101_p2, %p100_p1  ;;  %s85_s20 = ssub.s32 %s901_s13, %s1132_s17 }
   0xa   : > { %p730_p6 = scmp.ge.s32.totalorder %s905_s14, 1  ;;  %p88_p7 = scmp.eq.s32.totalorder %s85_s20, 0 }
   0xb   : > { %p972_p8 = por %p107_p5, %p106_p3  ;;  %p146_p9 = scmp.lt.s32.totalorder %s905_s14, 3 }
   0xc   : > { %s978_s22 = scalar_select %p88_p7, %s893_s11, %s90_s18  }
   0xd   : > { %p147_p10 = pnand %p730_p6, %p146_p9 }
   0xe   : > { %p178_p11 = scmp.lt.s32.totalorder (!%p147_p10), %s897_s12, 1  ;;  %v193_v0 = vlaneseq (!%p147_p10)  ;;  %v907_v1 = vmov (!%p147_p10), 0.0   ;;  %vm328_vm4 = vcmask (!%p147_p10), 130048   ;;  %s174_s4 = sand.u32 (!%p147_p10), 1, %s889_s10  }
   0xf   : > { %150 = sbr.rel (%p147_p10) target bundleno = 319 (0x13f), region = 28  ;;  %417 = vmatprep.mubr.f32.mxu0 (!%p147_p10), %v907_v1  ;;  %441 = vmatprep.mubr.f32.mxu1 (!%p147_p10), %v907_v1  ;;  %s731_s5 = sshll.u32 (!%p147_p10), %s174_s4, 3 }
  0x10   : > { %v194_v2 = vand.u32 (!%p147_p10), 127, %v193_v0  ;;  %v988_v3 = vshrl.u32 (!%p147_p10), %v193_v0, 7  ;;  %vm1048_vm5 = vcmp.lt.s32.totalorder (!%p147_p10), %v193_v0, 256  ;;  %s176_s6 = scalar_lea.vmem (!%p147_p10), [#allocation2], %s731_s5  ;;  %s763_s7 = sshll.u32 (!%p147_p10), %s897_s12, 7 }
  0x11   : > { %s638_s8 = sshll.u32 (!%p147_p10), %s176_s6, 4  ;;  %s1066_s18 = scalar_lea.hbm (!%p147_p10), %s1121_s2, %s763_s7  ;;  %s1068_s8 = int_to_ptr.vmem [resolvable:$true] %s638_s8 }
  0x12   : > { %v195_v4 = vadd.s32 (!%p147_p10), 128, %v194_v2  ;;  %v238_v5 = vsub.s32 (!%p147_p10), 1, %v988_v3  ;;  %v200_v6 = vcvt.s32.f32 (!%p147_p10), %v194_v2  ;;  %v998_v19 = vsub.s32 (!%p147_p10), 0, %v988_v3  ;;  %s827_s20 = scalar_lea.vmem (!%p147_p10), %s1068_s8, 128 }
  0x13   : > { %v269_v40 = vadd.s32 (!%p147_p10), 8, %v988_v3  ;;  %v1004_v45 = vcvt.s32.f32 (!%p147_p10), %v988_v3  ;;  %p828_p12 = scmp.ne.s32.totalorder (!%p147_p10), %s1068_s8, %s827_s20 }
  0x14   : > { %v201_v7 = vcvt.s32.f32 (!%p147_p10), %v195_v4  ;;  %v202_v10 = vmul.f32 (!%p147_p10), 0.0625, %v200_v6 }
  0x15   : > { %v1006_v46 = vcvt.s32.f32 (!%p147_p10), %v269_v40  ;;  %p829_p13 = pnand (!%p147_p10), %p828_p12, %p965_p4 }
  0x16   : > { %s984_s23 = scalar_select %p178_p11, %s897_s12, 1  ;;  %v203_v11 = vmul.f32 0.0625, %v201_v7  ;;  %v204_v12 = vfloor.f32 %v202_v10 }
  0x17   : > { %s622_s12 = scalar_lea.sflag [#allocation3], %s174_s4  ;;  %p830_p0 = pneg %p829_p13 }
  0x18   : > { %s761_s24 = sshll.u32 %s984_s23, 2  ;;  %v205_v13 = vfloor.f32 %v203_v11  ;;  %v206_v14 = vmul.f32 16.0, %v204_v12  ;;  %v736_v17 = vadd.f32 -1.0, %v204_v12  ;;  %s762_s28 = sshll.u32 %s984_s23, 6 }
  0x19   : > { %s185_s27 = scalar_lea.vmem %s1119_s0, %s761_s24  ;;  %s191_s3 = scalar_lea.vmem %s1120_s1, %s762_s28 }
  0x1a   : > { %v742_v8 = vld [vmem:[%s185_s27 + $0x1] ss:$2 sm:$0x3]  ;;  %v207_v15 = vmul.f32 16.0, %v205_v13  ;;  %v737_v18 = vadd.f32 -1.0, %v205_v13  ;;  %v208_v20 = vsub.f32 %v200_v6, %v206_v14  ;;  %v321_v11 = vld [vmem:[%s191_s3 + $0x8] sm:$0xff] }
  0x1b   : > { %v995_v9 = vrot.slane %v742_v8, %v238_v5  ;;  %v230_v16 = vld [vmem:[%s185_s27] ss:$2 sm:$0x3]  ;;  %v254_v25 = vrot.slane %v742_v8, %v998_v19  ;;  %v326_v14 = vld [vmem:[%s191_s3 + $0x30] sm:$0xff]  ;;  %s909_s23 = smov [#allocation2]  }
  0x1c   : > { %v209_v21 = vsub.f32 %v201_v7, %v207_v15  ;;  %v239_v22 = vrot.slane %v230_v16, %v238_v5  ;;  %vm210_vm0 = vcmp.lt.f32.partialorder %v208_v20, 0.0  ;;  %v216_v23 = vadd.f32 16.0, %v208_v20  ;;  %v320_v8 = vld [vmem:[%s191_s3] sm:$0xff]  ;;  %v323_v15 = vld [vmem:[%s191_s3 + $0x18] sm:$0xff]  ;;  %s831_s24 = sshll.u32 %s909_s23, 4  ;;  %s832_s24 = int_to_ptr.vmem [resolvable:$false] %s831_s24 }
  0x1d   : > { %v214_v26 = vsel %vm210_vm0, %v736_v17, %v204_v12  ;;  %v235_v30 = vrot.slane %v230_v16, %v998_v19  ;;  %v324_v10 = vld [vmem:[%s191_s3 + $0x20] sm:$0xff]  ;;  %v325_v12 = vld [vmem:[%s191_s3 + $0x28] sm:$0xff]  ;;  %v327_v16 = vld [vmem:[%s191_s3 + $0x38] sm:$0xff]  ;;  %s833_s25 = scalar_lea.vmem %s832_s24, 256  ;;  %p834_p1 = scmp.lt.s32.totalorder %s1068_s8, %s832_s24 }
  0x1e   : > { %vm211_vm1 = vcmp.lt.f32.partialorder %v209_v21, 0.0  ;;  %v217_v24 = vadd.f32 16.0, %v209_v21  ;;  %v218_v28 = vsel %vm210_vm0, %v216_v23, %v208_v20  ;;  %v222_v29 = vadd.f32 1.0, %v214_v26  ;;  %p835_p2 = scmp.lt.s32.totalorder %s833_s25, %s827_s20 }
  0x1f   : > { %v215_v27 = vsel %vm211_vm1, %v737_v18, %v205_v13  ;;  %vm220_vm2 = vcmp.ge.f32.partialorder %v218_v28, 16.0  ;;  %v738_v33 = vadd.f32 -16.0, %v218_v28  ;;  %v322_v13 = vld [vmem:[%s191_s3 + $0x10] sm:$0xff] }
  0x20   : > { %v219_v31 = vsel %vm211_vm1, %v217_v24, %v209_v21  ;;  %v223_v32 = vadd.f32 1.0, %v215_v27  ;;  %v224_v35 = vsel %vm220_vm2, %v222_v29, %v214_v26  ;;  %p836_p3 = por %p835_p2, %p834_p1 }
  0x21   : > { %vm221_vm3 = vcmp.ge.f32.partialorder %v219_v31, 16.0  ;;  %v739_v34 = vadd.f32 -16.0, %v219_v31  ;;  %v228_v37 = vsel %vm220_vm2, %v738_v33, %v218_v28  ;;  %v261_v38 = vadd.f32 %v254_v25, %v224_v35 }
  0x22   : > { %v225_v36 = vsel %vm221_vm3, %v223_v32, %v215_v27  ;;  %v242_v41 = vadd.f32 %v235_v30, %v228_v37  ;;  %p837_p5 = pnand %p836_p3, %p830_p0 }
  0x23   : > { %v229_v39 = vsel %vm221_vm3, %v739_v34, %v219_v31  ;;  %v262_v17 = vadd.f32 %v995_v9, %v225_v36  ;;  %v263_v18 = vmul.f32 1.0666667, %v261_v38 }
  0x24   : > { %v243_v42 = vadd.f32 %v239_v22, %v229_v39  ;;  %v244_v43 = vmul.f32 1.0666667, %v242_v41 }
  0x25   : > { %v264_v20 = vmul.f32 1.0666667, %v262_v17  ;;  %v743_v21 = vadd.f32 -0.5, %v263_v18 }
  0x26   : > { %v245_v44 = vmul.f32 1.0666667, %v243_v42  ;;  %v740_v47 = vadd.f32 -0.5, %v244_v43 }
  0x27   : > { %v744_v22 = vadd.f32 -0.5, %v264_v20  ;;  %v299_v23 = vrot.slane %v743_v21, %v998_v19 }
  0x28   : > { %v741_v48 = vadd.f32 -0.5, %v245_v44  ;;  %v275_v49 = vrot.slane %v740_v47, %v998_v19  ;;  %v908_v47 = vmov 1966171168  }
  0x29   : > { %v303_v24 = vrot.slane %v744_v22, %v998_v19  ;;  %v304_v25 = vsub.f32 %v1004_v45, %v299_v23  ;;  %v306_v27 = vsub.f32 %v1006_v46, %v299_v23 }
  0x2a   : > { %v279_v50 = vrot.slane %v741_v48, %v998_v19  ;;  %v280_v51 = vsub.f32 %v1004_v45, %v275_v49  ;;  %v282_v52 = vsub.f32 %v1006_v46, %v275_v49 }
  0x2b   : > { %v308_v26 = vand.u32 2147483647, %v304_v25  ;;  %v307_v29 = vsub.f32 %v1006_v46, %v303_v24  ;;  %v310_v9 = vand.u32 2147483647, %v306_v27 }
  0x2c   : > { %v281_v53 = vsub.f32 %v1004_v45, %v279_v50  ;;  %v283_v54 = vsub.f32 %v1006_v46, %v279_v50  ;;  %v284_v55 = vand.u32 2147483647, %v280_v51  ;;  %v286_v56 = vand.u32 2147483647, %v282_v52 }
  0x2d   : > { %v312_v30 = vsub.f32 1.0, %v308_v26  ;;  %v311_v32 = vand.u32 2147483647, %v307_v29  ;;  %v314_v34 = vsub.f32 1.0, %v310_v9  ;;  %v488_v46 = vunpack.c.l.s4 %v908_v47 }
  0x2e   : > { %v285_v57 = vand.u32 2147483647, %v281_v53  ;;  %v287_v58 = vand.u32 2147483647, %v283_v54  ;;  %v288_v59 = vsub.f32 1.0, %v284_v55  ;;  %v290_v60 = vsub.f32 1.0, %v286_v56 }
  0x2f   : > { %v316_v33 = vmax.f32 %v312_v30, 0.0  ;;  %v315_v36 = vsub.f32 1.0, %v311_v32  ;;  %v318_v42 = vmax.f32 %v314_v34, 0.0 }
  0x30   : > { %v289_v61 = vsub.f32 1.0, %v285_v57  ;;  %v291_v62 = vsub.f32 1.0, %v287_v58  ;;  %v292_v63 = vmax.f32 %v288_v59, 0.0  ;;  %v294_v2 = vmax.f32 %v290_v60, 0.0 }
  0x31   : > { %v489_v58 = vunpack.c.0.s8 %v488_v46 }
  0x32   : > { %v293_v4 = vmax.f32 %v289_v61, 0.0  ;;  %v295_v5 = vmax.f32 %v291_v62, 0.0  ;;  %v766_v6 = vpack.c.bf16 %v294_v2, %v292_v63 }
  0x34   : > { %v764_v7 = vpack.c.bf16 %v295_v5, %v293_v4 }
  0x36   : > { %765 = vmatprep.subr.bf16.mxu0 %v764_v7  ;;  %768 = vmatprep.subr.bf16.mxu1 %v764_v7 }
  0x37   : > { %767 = vmatpush1.bf16.msra.mxu0 %v766_v6  ;;  %769 = vmatpush1.bf16.msra.mxu1 %v766_v6 }
  0x3a   : > { %745 = vmatmul.mubr.msk.f32.vlgmr.msra.gmra.mrb[0].mxu0 %vm328_vm4, %v320_v8  ;;  %749 = vmatmul.mubr.msk.f32.vlgmr.msra.gmra.mrb[0].mxu1 %vm328_vm4, %v324_v10 }
  0x3b   : > { %423 = vmatprep.mubr.f32.mxu0 %v907_v1  ;;  %447 = vmatprep.mubr.f32.mxu1 %v907_v1 }
  0x3e   : > { %746 = vmatmul.mubr.msk.f32.gmra.mrb[2].mxu0 %vm328_vm4, %v321_v11  ;;  %750 = vmatmul.mubr.msk.f32.gmra.mrb[2].mxu1 %vm328_vm4, %v325_v12 }
  0x3f   : > { %429 = vmatprep.mubr.f32.mxu0 %v907_v1  ;;  %453 = vmatprep.mubr.f32.mxu1 %v907_v1 }
  0x42   : > { %747 = vmatmul.mubr.msk.f32.gmra.mrb[4].mxu0 %vm328_vm4, %v322_v13  ;;  %751 = vmatmul.mubr.msk.f32.gmra.mrb[4].mxu1 %vm328_vm4, %v326_v14 }
  0x43   : > { %435 = vmatprep.mubr.f32.mxu0 %v907_v1  ;;  %459 = vmatprep.mubr.f32.mxu1 %v907_v1  ;;  %v305_v1 = vsub.f32 %v1004_v45, %v303_v24  ;;  %v319_v45 = vmax.f32 %v315_v36, 0.0 }
  0x45   : > { %v309_v28 = vand.u32 2147483647, %v305_v1 }
  0x46   : > { %748 = vmatmul.mubr.msk.f32.gmra.mrb[6].mxu0 %vm328_vm4, %v323_v15  ;;  %752 = vmatmul.mubr.msk.f32.gmra.mrb[6].mxu1 %vm328_vm4, %v327_v16  ;;  %v1040_v15 = vsub.s32 %v489_v58, %v988_v3 }
  0x47   : > { %v313_v31 = vsub.f32 1.0, %v309_v28 }
  0x49   : > { %v317_v35 = vmax.f32 %v313_v31, 0.0 }
 0x10d   : > { %v419_v37 = vpop.f32.mrb[0].mxu0  ;;  %v443_v19 = vpop.f32.mrb[0].mxu1 }
 0x10e   : > { %v466_v38 = vmul.f32 %v419_v37, %v316_v33  ;;  %v545_v39 = vmul.f32 %v443_v19, %v316_v33  ;;  %v421_v40 = vpop.f32.mrb[1].mxu0  ;;  %v445_v41 = vpop.f32.mrb[1].mxu1 }
 0x10f   : > { %v467_v43 = vmul.f32 %v421_v40, %v317_v35  ;;  %v546_v44 = vmul.f32 %v445_v41, %v317_v35 }
 0x111   : > { %v425_v48 = vpop.f32.mrb[2].mxu0  ;;  %v449_v49 = vpop.f32.mrb[2].mxu1 }
 0x112   : > { %v468_v50 = vmul.f32 %v425_v48, %v318_v42  ;;  %v547_v51 = vmul.f32 %v449_v49, %v318_v42  ;;  %v427_v52 = vpop.f32.mrb[3].mxu0  ;;  %v451_v53 = vpop.f32.mrb[3].mxu1 }
 0x113   : > { %v469_v54 = vmul.f32 %v427_v52, %v319_v45  ;;  %v548_v55 = vmul.f32 %v451_v53, %v319_v45 }
 0x114   : > { %v470_v56 = vadd.f32 %v468_v50, %v466_v38  ;;  %v549_v57 = vadd.f32 %v547_v51, %v545_v39 }
 0x115   : > { %v477_v59 = vadd.f32 %v469_v54, %v467_v43  ;;  %v556_v60 = vadd.f32 %v548_v55, %v546_v44  ;;  %v431_v61 = vpop.f32.mrb[4].mxu0  ;;  %v455_v62 = vpop.f32.mrb[4].mxu1 }
 0x116   : > { %v471_v63 = vrot.slane %v470_v56, 4  ;;  %v550_v2 = vrot.slane %v549_v57, 4  ;;  %v507_v4 = vmul.f32 %v431_v61, %v316_v33  ;;  %v583_v5 = vmul.f32 %v455_v62, %v316_v33  ;;  %v433_v6 = vpop.f32.mrb[5].mxu0  ;;  %v457_v7 = vpop.f32.mrb[5].mxu1 }
 0x117   : > { %v478_v8 = vrot.slane %v477_v59, 4  ;;  %v557_v10 = vrot.slane %v556_v60, 4  ;;  %v508_v11 = vmul.f32 %v433_v6, %v317_v35  ;;  %v584_v12 = vmul.f32 %v457_v7, %v317_v35 }
 0x118   : > { %v472_v13 = vadd.f32 %v471_v63, %v470_v56  ;;  %v551_v14 = vadd.f32 %v550_v2, %v549_v57 }
 0x119   : > { %v479_v16 = vadd.f32 %v478_v8, %v477_v59  ;;  %v558_v17 = vadd.f32 %v557_v10, %v556_v60  ;;  %v437_v18 = vpop.f32.mrb[6].mxu0  ;;  %v461_v20 = vpop.f32.mrb[6].mxu1 }
 0x11a   : > { %v473_v21 = vrot.slane %v472_v13, 2  ;;  %v552_v22 = vrot.slane %v551_v14, 2  ;;  %v509_v23 = vmul.f32 %v437_v18, %v318_v42  ;;  %v585_v24 = vmul.f32 %v461_v20, %v318_v42  ;;  %v439_v25 = vpop.f32.mrb[7].mxu0  ;;  %v463_v1 = vpop.f32.mrb[7].mxu1 }
 0x11b   : > { %v480_v26 = vrot.slane %v479_v16, 2  ;;  %v559_v27 = vrot.slane %v558_v17, 2  ;;  %v510_v28 = vmul.f32 %v439_v25, %v319_v45  ;;  %v586_v29 = vmul.f32 %v463_v1, %v319_v45 }
 0x11c   : > { %v474_v30 = vadd.f32 %v473_v21, %v472_v13  ;;  %v553_v9 = vadd.f32 %v552_v22, %v551_v14  ;;  %v511_v31 = vadd.f32 %v509_v23, %v507_v4  ;;  %v587_v32 = vadd.f32 %v585_v24, %v583_v5 }
 0x11d   : > { %v481_v3 = vadd.f32 %v480_v26, %v479_v16  ;;  %v560_v33 = vadd.f32 %v559_v27, %v558_v17  ;;  %v518_v34 = vadd.f32 %v510_v28, %v508_v11  ;;  %v594_v35 = vadd.f32 %v586_v29, %v584_v12 }
 0x11e   : > { %v475_v36 = vrot.slane %v474_v30, 1  ;;  %v554_v37 = vrot.slane %v553_v9, 1  ;;  %v512_v19 = vrot.slane %v511_v31, 4  ;;  %v588_v38 = vrot.slane %v587_v32, 4 }
 0x11f   : > { %v482_v39 = vrot.slane %v481_v3, 1  ;;  %v561_v40 = vrot.slane %v560_v33, 1  ;;  %v519_v41 = vrot.slane %v518_v34, 4  ;;  %v595_v42 = vrot.slane %v594_v35, 4 }
 0x120   : > { %v476_v43 = vadd.f32 %v475_v36, %v474_v30  ;;  %v555_v44 = vadd.f32 %v554_v37, %v553_v9  ;;  %v513_v45 = vadd.f32 %v512_v19, %v511_v31  ;;  %v589_v47 = vadd.f32 %v588_v38, %v587_v32 }
 0x121   : > { %v483_v46 = vadd.f32 %v482_v39, %v481_v3  ;;  %v562_v48 = vadd.f32 %v561_v40, %v560_v33  ;;  %v520_v49 = vadd.f32 %v519_v41, %v518_v34  ;;  %v596_v50 = vadd.f32 %v595_v42, %v594_v35 }
 0x122   : > { %v514_v51 = vrot.slane %v513_v45, 2  ;;  %v590_v52 = vrot.slane %v589_v47, 2 }
 0x123   : > { %v486_v53 = vcombine.low %v476_v43, %v483_v46  ;;  %v565_v54 = vcombine.low %v555_v44, %v562_v48  ;;  %v521_v55 = vrot.slane %v520_v49, 2  ;;  %v597_v56 = vrot.slane %v596_v50, 2 }
 0x124   : > { %v515_v57 = vadd.f32 %v514_v51, %v513_v45  ;;  %v591_v58 = vadd.f32 %v590_v52, %v589_v47 }
 0x125   : > { %v493_v59 = vrot.slane %v486_v53, %v1040_v15  ;;  %v572_v60 = vrot.slane %v565_v54, %v1040_v15  ;;  %v522_v61 = vadd.f32 %v521_v55, %v520_v49  ;;  %v598_v62 = vadd.f32 %v597_v56, %v596_v50 }
 0x126   : > { %v516_v63 = vrot.slane %v515_v57, 1  ;;  %v592_v2 = vrot.slane %v591_v58, 1 }
 0x127   : > { %v500_v5 = vrot.slane %v493_v59, %v1040_v15  ;;  %v579_v6 = vrot.slane %v572_v60, %v1040_v15  ;;  %v523_v7 = vrot.slane %v522_v61, 1  ;;  %v599_v8 = vrot.slane %v598_v62, 1 }
 0x128   : > { %v517_v10 = vadd.f32 %v516_v63, %v515_v57  ;;  %v593_v11 = vadd.f32 %v592_v2, %v591_v58 }
 0x129   : > { %v524_v12 = vadd.f32 %v523_v7, %v522_v61  ;;  %v600_v13 = vadd.f32 %v599_v8, %v598_v62  ;;  %506 = vst.msk [vmem:[%s176_s6] ss:$4 sm:$0x3] %vm1048_vm5, %v500_v5  ;;  %754 = vst.msk [vmem:[%s176_s6 + $0x2] ss:$4 sm:$0x3] %vm1048_vm5, %v579_v6 }
 0x12b   : > { %v527_v0 = vcombine.low %v517_v10, %v524_v12  ;;  %v603_v14 = vcombine.low %v593_v11, %v600_v13 }
 0x12d   : > { %v534_v16 = vrot.slane %v527_v0, %v1040_v15  ;;  %v610_v17 = vrot.slane %v603_v14, %v1040_v15 }
 0x12f   : > { %v541_v18 = vrot.slane %v534_v16, %v1040_v15  ;;  %v617_v20 = vrot.slane %v610_v17, %v1040_v15 }
 0x131   : > { %753 = vst.msk [vmem:[%s176_s6 + $0x1] ss:$4 sm:$0x3] %vm1048_vm5, %v541_v18  ;;  %755 = vst.msk [vmem:[%s176_s6 + $0x3] ss:$4 sm:$0x3] %vm1048_vm5, %v617_v20 }
 0x132   : > { %840 = shalt.err (!%p837_p5)
}
 0x133   : > { %s841_s26 = scalar_lea.hbm %s1066_s18, 128  ;;  %s845_s29 = scalar_lea.hbm %s1121_s2, 256 }
 0x134   : > { %p842_p6 = scmp.ne.s32.totalorder %s1066_s18, %s841_s26  ;;  %p846_p10 = scmp.lt.u32.totalorder %s1066_s18, %s1121_s2 }
 0x135   : > { %p847_p11 = scmp.lt.u32.totalorder %s845_s29, %s841_s26  ;;  %p849_p13 = scmp.lt.u32.totalorder %s841_s26, %s1066_s18 }
 0x136   : > { %p843_p7 = pnand %p842_p6, %p965_p4 }
 0x137   : > { %p848_p12 = por %p847_p11, %p846_p10 }
 0x138   : > { %p844_p9 = pneg %p843_p7 }
 0x139   : > { %p850_p0 = por %p849_p13, %p848_p12 }
 0x13b   : > { %p851_p1 = pnand %p850_p0, %p844_p9 }
 0x13d   : > { %854 = shalt.err (!%p851_p1)
}
 0x13e   : > { %770 = dma.vmem_to_hbm [thread:$0]  (%p965_p4), %s1068_s8, 128, %s1066_s18, %s622_s12  }
 0x13f PF: > { %p776_p2 = scmp.ge.s32.totalorder %s905_s14, 2  ;;  %s650_s4 = sand.u32 1, %s885_s9  }
 0x140   : > { %s651_s5 = scalar_lea.sflag [#allocation3], %s650_s4 }
 0x141   : > { %p773_p3 = pnand %p776_p2, %p972_p8 }
 0x143   : > { %880 = dma.done.wait (!%p773_p3), %s651_s5, 128  }
 0x144   : > { %882 = vsyncadd (!%p773_p3), %s651_s5, 4294967168  ;;  %s15_s14 = sadd.s32 1, %s905_s14   ;;  %s1126_s9 = smov %s889_s10 }
 0x145   : > { %p12_p5 = scmp.ge.s32.totalorder %s15_s14, 4   ;;  %s1127_s10 = smov %s893_s11 }
 0x146   : > { %s1128_s11 = smov %s978_s22  ;;  %s1129_s12 = smov %s901_s13 }
 0x147   : > { %s1130_s13 = smov %s1132_s17  ;;  %14 = sbr.rel (!%p12_p5) target bundleno = 4 (0x4), region = 70 }
 0x14e   :  { %656 = vsyncpa [#allocation3], 1 }
 0x14f   :  { %658 = vsyncpa [#allocation3 + $0x1], 1 }

</bundles_post_ra>
